<compile_context>
chip_gen: v7x
topology: tpu7x:2x2x1
jax: 0.10.0
libtpu: 0.0.40
codegen_flags: <defaults>
</compile_context>

<pallas_src>
import functools
import math

import jax
import jax.numpy as jnp
from jax.experimental import pallas as pl
from jax.experimental.pallas import tpu as pltpu


# -----------------------------------------------------------------------------
# Pallas kernel: one grid step == one LSTM layer; final Linear fused in.
# -----------------------------------------------------------------------------
def fused_lstm_kernel(x_ref, wih_ref, whh_ref, b_ref, wout_ref, bout_ref,
                      out_ref, seq_scr, xg_scr, act_scr, *, H, B):
    """x_ref   : (T*B, RIN) f32   time-major input, features zero-padded to RIN
       wih_ref : (1, RIN, 4H) bf16  this layer's W_ih^T (packed gates [i|f|g|o])
       whh_ref : (1, RIN, 4H) bf16  this layer's W_hh^T
       b_ref   : (1, 1, 4H)  f32    b_ih + b_hh
       wout_ref: (RIN, LP)   bf16   W_out^T (rows >= H are zero)
       bout_ref: (1, LP)     f32
       out_ref : (B, LP)     f32    logits (lane-dense; sliced outside)
       seq_scr : (T*B, RIN)  f32    hidden sequence feeding the next layer
       xg_scr  : (T*B, 4H)   f32    hoisted input-side gate pre-activations
       act_scr : (B, 4H)     f32    per-step packed gate activations
    """
    layer = pl.program_id(0)
    TB, RIN = seq_scr.shape
    G4 = xg_scr.shape[-1]
    T = TB // B

    # Layer 0: seed the sequence buffer with the (padded) network input.
    @pl.when(layer == 0)
    def _():
        seq_scr[...] = x_ref[...]

    # ---- hoisted input projection: all T timesteps in one bf16 MXU matmul ----
    inp = seq_scr[...].astype(jnp.bfloat16)
    xg_scr[...] = (jnp.dot(inp, wih_ref[0], preferred_element_type=jnp.float32)
                   + b_ref[0])                      # bias folded in for free

    whh = whh_ref[0]                                # (RIN, 4H) bf16, stays in VMEM

    # Lane masks (hoisted): gate g occupies lanes [2H, 3H) of the packed tile.
    lane = jax.lax.broadcasted_iota(jnp.int32, (B, G4), 1)
    g_mask = (lane >= 2 * H) & (lane < 3 * H)
    scale = jnp.where(g_mask, 1.0, 0.5).astype(jnp.float32)

    # ---- recurrence: one small matmul + 2 EUP pushes per step ----
    h = jnp.zeros((B, RIN), jnp.float32)            # padded lanes stay exactly 0
    c = jnp.zeros((B, H), jnp.float32)
    for t in range(T):                              # T small & static -> unrolled
        row = pl.ds(t * B, B)
        gates = xg_scr[row] + jnp.dot(h.astype(jnp.bfloat16), whh,
                                      preferred_element_type=jnp.float32)
        # sigmoid(x) = 0.5*tanh(x/2)+0.5 -> a single tanh over the packed vreg,
        # pre-scaled so the g-lanes get tanh(x) and i/f/o-lanes get tanh(x/2).
        th = jnp.tanh(gates * scale)
        act_scr[...] = jnp.where(g_mask, th, 0.5 * th + 0.5)   # [s(i)|s(f)|tanh(g)|s(o)]
        i_g = act_scr[:, 0:H]
        f_g = act_scr[:, H:2 * H]
        g_g = act_scr[:, 2 * H:3 * H]
        o_g = act_scr[:, 3 * H:4 * H]
        c = f_g * c + i_g * g_g
        h_n = o_g * jnp.tanh(c)
        if RIN > H:                                 # static; not taken when RIN == H
            h = jnp.concatenate([h_n, jnp.zeros((B, RIN - H), jnp.float32)], axis=1)
        else:
            h = h_n
        seq_scr[row] = h                            # next layer's input sequence
    # TODO(synk): inter-layer dropout (p=0.3) is train-only; eval forward omits it.

    # ---- fused output projection on the final timestep of the top layer ----
    @pl.when(layer == pl.num_programs(0) - 1)
    def _():
        out_ref[...] = (jnp.dot(h.astype(jnp.bfloat16), wout_ref[...],
                                preferred_element_type=jnp.float32)
                        + bout_ref[...])


# -----------------------------------------------------------------------------
# Wrapper
# -----------------------------------------------------------------------------
def lstm_forward(x, params):
    """Equivalent of LSTM.forward (eval mode): x is batch-first (B, T, input_size)."""
    B, T, D = x.shape
    H = params["hidden"]
    NL, RIN, G4 = params["wih"].shape
    LP = params["wout"].shape[1]
    BP = pl.cdiv(B, 8) * 8                                       # sublane-align batch

    x_tm = jnp.transpose(x, (1, 0, 2))                           # (T, B, D)
    x_pad = jnp.pad(x_tm, ((0, 0), (0, BP - B), (0, RIN - D)))   # (T, BP, RIN)
    x_flat = x_pad.reshape(T * BP, RIN)                          # row = t*BP + b

    kernel = functools.partial(fused_lstm_kernel, H=H, B=BP)
    out_pad = pl.pallas_call(
        kernel,
        out_shape=jax.ShapeDtypeStruct((BP, LP), jnp.float32),
        grid_spec=pltpu.PrefetchScalarGridSpec(
            num_scalar_prefetch=0,
            grid=(NL,),                                           # one step per layer
            in_specs=[
                pl.BlockSpec((T * BP, RIN), lambda l: (0, 0)),    # x (resident)
                pl.BlockSpec((1, RIN, G4), lambda l: (l, 0, 0)),  # W_ih^T[l] (prefetched)
                pl.BlockSpec((1, RIN, G4), lambda l: (l, 0, 0)),  # W_hh^T[l] (prefetched)
                pl.BlockSpec((1, 1, G4), lambda l: (l, 0, 0)),    # bias[l]
                pl.BlockSpec((RIN, LP), lambda l: (0, 0)),        # W_out^T (resident)
                pl.BlockSpec((1, LP), lambda l: (0, 0)),          # b_out (resident)
            ],
            out_specs=pl.BlockSpec((BP, LP), lambda l: (0, 0)),
            scratch_shapes=[
                pltpu.VMEM((T * BP, RIN), jnp.float32),   # inter-layer hidden sequence
                pltpu.VMEM((T * BP, G4), jnp.float32),    # hoisted input gates
                pltpu.VMEM((BP, G4), jnp.float32),        # per-step gate activations
            ],
        ),
        compiler_params=pltpu.CompilerParams(
            dimension_semantics=("arbitrary",)),              # layers are sequential
    )(x_flat, params["wih"], params["whh"], params["b"],
      params["wout"], params["bout"])

    return out_pad[:B, :params["nb_labels"]]


# -----------------------------------------------------------------------------
# Parameter init (nn.LSTM / nn.Linear shapes) + packed-gate bf16 layout
# -----------------------------------------------------------------------------
def init_params(key, input_size, hidden_units, nb_layer, nb_labels):
    H = hidden_units
    k = 1.0 / math.sqrt(H)
    G4 = 4 * H                                       # packed gate width [i|f|g|o]
    RIN = ((max(input_size, H) + 7) // 8) * 8        # common (padded) input-row count
    LP = pl.cdiv(nb_labels, 128) * 128               # lane-dense output width

    wih_l, whh_l, b_l, raw = [], [], [], []
    for layer in range(nb_layer):
        d_in = input_size if layer == 0 else H
        key, k1, k2, k3, k4 = jax.random.split(key, 5)
        w_ih = jax.random.uniform(k1, (G4, d_in), jnp.float32, -k, k)
        w_hh = jax.random.uniform(k2, (G4, H), jnp.float32, -k, k)
        b_ih = jax.random.uniform(k3, (G4,), jnp.float32, -k, k)
        b_hh = jax.random.uniform(k4, (G4,), jnp.float32, -k, k)
        raw.append((w_ih, w_hh, b_ih, b_hh))
        wih_l.append(jnp.pad(w_ih.T, ((0, RIN - d_in), (0, 0))))   # (RIN, 4H), zero rows
        whh_l.append(jnp.pad(w_hh.T, ((0, RIN - H), (0, 0))))      # (RIN, 4H), zero rows
        b_l.append((b_ih + b_hh)[None, :])                         # (1, 4H)

    key, k1, k2 = jax.random.split(key, 3)
    w_out = jax.random.uniform(k1, (nb_labels, H), jnp.float32, -k, k)
    b_out = jax.random.uniform(k2, (nb_labels,), jnp.float32, -k, k)

    return {
        "wih": jnp.stack(wih_l).astype(jnp.bfloat16),              # (NL, RIN, 4H)
        "whh": jnp.stack(whh_l).astype(jnp.bfloat16),              # (NL, RIN, 4H)
        "b": jnp.stack(b_l),                                       # (NL, 1, 4H) f32
        "wout": jnp.pad(w_out.T, ((0, RIN - H), (0, LP - nb_labels))
                        ).astype(jnp.bfloat16),                    # (RIN, LP)
        "bout": jnp.pad(b_out[None, :], ((0, 0), (0, LP - nb_labels))),
        "nb_labels": nb_labels, "hidden": H,
        "_raw": raw, "_w_out": w_out, "_b_out": b_out,             # for the reference
    }


# -----------------------------------------------------------------------------
# Pure-JAX reference (mirrors PyTorch eval-mode semantics) for a sanity check
# -----------------------------------------------------------------------------
def lstm_ref(x, params):
    H = params["hidden"]
    h_seq = jnp.transpose(x, (1, 0, 2))
    for (w_ih, w_hh, b_ih, b_hh) in params["_raw"]:
        Bq = h_seq.shape[1]
        h = jnp.zeros((Bq, H), jnp.float32)
        c = jnp.zeros((Bq, H), jnp.float32)
        outs = []
        for t in range(h_seq.shape[0]):
            g = h_seq[t] @ w_ih.T + h @ w_hh.T + b_ih + b_hh
            i = jax.nn.sigmoid(g[:, :H])
            f = jax.nn.sigmoid(g[:, H:2 * H])
            gg = jnp.tanh(g[:, 2 * H:3 * H])
            o = jax.nn.sigmoid(g[:, 3 * H:])
            c = f * c + i * gg
            h = o * jnp.tanh(c)
            outs.append(h)
        h_seq = jnp.stack(outs)
    return h_seq[-1] @ params["_w_out"].T + params["_b_out"]


if __name__ == "__main__":
    # Small shapes consistent with the module's forward (batch_first LSTM):
    B, T = 8, 8
    input_size, hidden_units, nb_layer, nb_labels = 16, 32, 2, 8

    key = jax.random.PRNGKey(0)
    key, xk = jax.random.split(key)
    x = jax.random.normal(xk, (B, T, input_size), dtype=jnp.float32)

    params = init_params(key, input_size, hidden_units, nb_layer, nb_labels)

    out = lstm_forward(x, params)
    jax.block_until_ready(out)
    assert out.shape == (B, nb_labels)

    ref = lstm_ref(x, params)
    max_err = float(jnp.max(jnp.abs(out - ref)))
    assert jnp.allclose(out, ref, atol=5e-2, rtol=5e-2), f"max_err={max_err}"

    print("KERNEL_OK")
</pallas_src>

<mosaic_0001>
module attributes {stable_mosaic.version = 11 : i64} {
  func.func @fused_lstm_kernel(%arg0: i32, %arg1: memref<64x32xf32, #tpu.memory_space<vmem>>, %arg2: memref<1x32x128xbf16, #tpu.memory_space<vmem>>, %arg3: memref<1x32x128xbf16, #tpu.memory_space<vmem>>, %arg4: memref<1x1x128xf32, #tpu.memory_space<vmem>>, %arg5: memref<32x128xbf16, #tpu.memory_space<vmem>>, %arg6: memref<1x128xf32, #tpu.memory_space<vmem>>, %arg7: memref<8x128xf32, #tpu.memory_space<vmem>>, %arg8: memref<64x32xf32, #tpu.memory_space<vmem>>, %arg9: memref<64x128xf32, #tpu.memory_space<vmem>>, %arg10: memref<8x128xf32, #tpu.memory_space<vmem>>) attributes {dimension_semantics = [#tpu.dimension_semantics<arbitrary>], iteration_bounds = array<i64: 2>, scalar_prefetch = 0 : i64, scratch_operands = 3 : i64, tpu.core_type = #tpu.core_type<tc>, window_params = [{pipeline_mode = #tpu.pipeline_mode<synchronous>, transform_indices = @transform_0, window_bounds = array<i64: 64, 32>}, {transform_indices = @transform_1, window_bounds = array<i64: 1, 32, 128>}, {transform_indices = @transform_2, window_bounds = array<i64: 1, 32, 128>}, {transform_indices = @transform_3, window_bounds = array<i64: 1, 1, 128>}, {pipeline_mode = #tpu.pipeline_mode<synchronous>, transform_indices = @transform_4, window_bounds = array<i64: 32, 128>}, {pipeline_mode = #tpu.pipeline_mode<synchronous>, transform_indices = @transform_5, window_bounds = array<i64: 1, 128>}, {pipeline_mode = #tpu.pipeline_mode<synchronous>, transform_indices = @transform_6, window_bounds = array<i64: 8, 128>}]} {
    %c0_i32 = arith.constant 0 : i32
    %0 = arith.cmpi eq, %arg0, %c0_i32 : i32
    %1 = arith.extui %0 : i1 to i32
    %c0_i32_0 = arith.constant 0 : i32
    %2 = arith.cmpi ne, %1, %c0_i32_0 : i32
    scf.if %2 {
      %c0_145 = arith.constant 0 : index
      %c0_146 = arith.constant 0 : index
      %205 = vector.load %arg1[%c0_145, %c0_146] : memref<64x32xf32, #tpu.memory_space<vmem>>, vector<64x32xf32>
      %c0_147 = arith.constant 0 : index
      %c0_148 = arith.constant 0 : index
      %206 = vector.load %arg8[%c0_147, %c0_148] : memref<64x32xf32, #tpu.memory_space<vmem>>, vector<64x32xf32>
      tpu.vector_store %arg8[%c0_147, %c0_148], %205 {strides = array<i32>} : memref<64x32xf32, #tpu.memory_space<vmem>>, vector<64x32xf32>,
    } else {
    }
    %c0 = arith.constant 0 : index
    %c0_1 = arith.constant 0 : index
    %3 = vector.load %arg8[%c0, %c0_1] : memref<64x32xf32, #tpu.memory_space<vmem>>, vector<64x32xf32>
    %4 = arith.truncf %3 : vector<64x32xf32> to vector<64x32xbf16>
    %c0_2 = arith.constant 0 : index
    %c0_3 = arith.constant 0 : index
    %c0_4 = arith.constant 0 : index
    %5 = vector.load %arg2[%c0_2, %c0_3, %c0_4] : memref<1x32x128xbf16, #tpu.memory_space<vmem>>, vector<1x32x128xbf16>
    %6 = vector.shape_cast %5 : vector<1x32x128xbf16> to vector<32x128xbf16>
    %cst = arith.constant dense<0.000000e+00> : vector<64x128xf32>
    %7 = tpu.matmul %4, %6, %cst {dimension_numbers = #tpu.dot_dimension_numbers<[1], [0], [0], [1], [0, 0, 1, 1], [], []>} : vector<64x32xbf16>, vector<32x128xbf16>, vector<64x128xf32> -> vector<64x128xf32>
    %c0_5 = arith.constant 0 : index
    %c0_6 = arith.constant 0 : index
    %c0_7 = arith.constant 0 : index
    %8 = vector.load %arg4[%c0_5, %c0_6, %c0_7] : memref<1x1x128xf32, #tpu.memory_space<vmem>>, vector<1x1x128xf32>
    %9 = vector.shape_cast %8 : vector<1x1x128xf32> to vector<1x128xf32>
    %10 = vector.broadcast %9 : vector<1x128xf32> to vector<64x128xf32>
    %11 = arith.addf %7, %10 : vector<64x128xf32>
    %c0_8 = arith.constant 0 : index
    %c0_9 = arith.constant 0 : index
    %12 = vector.load %arg9[%c0_8, %c0_9] : memref<64x128xf32, #tpu.memory_space<vmem>>, vector<64x128xf32>
    tpu.vector_store %arg9[%c0_8, %c0_9], %11 {strides = array<i32>} : memref<64x128xf32, #tpu.memory_space<vmem>>, vector<64x128xf32>,
    %c0_10 = arith.constant 0 : index
    %c0_11 = arith.constant 0 : index
    %c0_12 = arith.constant 0 : index
    %13 = vector.load %arg3[%c0_10, %c0_11, %c0_12] : memref<1x32x128xbf16, #tpu.memory_space<vmem>>, vector<1x32x128xbf16>
    %14 = vector.shape_cast %13 : vector<1x32x128xbf16> to vector<32x128xbf16>
    %15 = tpu.iota {dimensions = array<i32: 1>} : vector<8x128xi32>
    %c64_i32 = arith.constant 64 : i32
    %16 = vector.broadcast %c64_i32 : i32 to vector<8x128xi32>
    %17 = arith.cmpi sge, %15, %16 : vector<8x128xi32>
    %c96_i32 = arith.constant 96 : i32
    %18 = vector.broadcast %c96_i32 : i32 to vector<8x128xi32>
    %19 = arith.cmpi slt, %15, %18 : vector<8x128xi32>
    %20 = arith.andi %17, %19 : vector<8x128xi1>
    %cst_13 = arith.constant 1.000000e+00 : f32
    %cst_14 = arith.constant 5.000000e-01 : f32
    %21 = vector.broadcast %cst_13 : f32 to vector<8x128xf32>
    %22 = vector.broadcast %cst_14 : f32 to vector<8x128xf32>
    %23 = arith.select %20, %21, %22 : vector<8x128xi1>, vector<8x128xf32>
    %cst_15 = arith.constant 0.000000e+00 : f32
    %24 = vector.broadcast %cst_15 : f32 to vector<8x32xf32>
    %cst_16 = arith.constant 0.000000e+00 : f32
    %25 = vector.broadcast %cst_16 : f32 to vector<8x32xf32>
    %c0_17 = arith.constant 0 : index
    %c0_18 = arith.constant 0 : index
    %26 = vector.load %arg9[%c0_17, %c0_18] : memref<64x128xf32, #tpu.memory_space<vmem>>, vector<8x128xf32>
    %27 = arith.truncf %24 : vector<8x32xf32> to vector<8x32xbf16>
    %cst_19 = arith.constant dense<0.000000e+00> : vector<8x128xf32>
    %28 = tpu.matmul %27, %14, %cst_19 {dimension_numbers = #tpu.dot_dimension_numbers<[1], [0], [0], [1], [0, 0, 1, 1], [], []>} : vector<8x32xbf16>, vector<32x128xbf16>, vector<8x128xf32> -> vector<8x128xf32>
    %29 = arith.addf %26, %28 : vector<8x128xf32>
    %30 = arith.mulf %29, %23 : vector<8x128xf32>
    %31 = math.tanh %30 : vector<8x128xf32>
    %cst_20 = arith.constant 5.000000e-01 : f32
    %32 = vector.broadcast %cst_20 : f32 to vector<8x128xf32>
    %33 = arith.mulf %32, %31 : vector<8x128xf32>
    %cst_21 = arith.constant 5.000000e-01 : f32
    %34 = vector.broadcast %cst_21 : f32 to vector<8x128xf32>
    %35 = arith.addf %33, %34 : vector<8x128xf32>
    %36 = arith.select %20, %31, %35 : vector<8x128xi1>, vector<8x128xf32>
    %c0_22 = arith.constant 0 : index
    %c0_23 = arith.constant 0 : index
    %37 = vector.load %arg10[%c0_22, %c0_23] : memref<8x128xf32, #tpu.memory_space<vmem>>, vector<8x128xf32>
    tpu.vector_store %arg10[%c0_22, %c0_23], %36 {strides = array<i32>} : memref<8x128xf32, #tpu.memory_space<vmem>>, vector<8x128xf32>,
    %c0_24 = arith.constant 0 : index
    %c0_25 = arith.constant 0 : index
    %38 = vector.load %arg10[%c0_24, %c0_25] : memref<8x128xf32, #tpu.memory_space<vmem>>, vector<8x32xf32>
    %c0_26 = arith.constant 0 : index
    %c32 = arith.constant 32 : index
    %39 = vector.load %arg10[%c0_26, %c32] : memref<8x128xf32, #tpu.memory_space<vmem>>, vector<8x32xf32>
    %c0_27 = arith.constant 0 : index
    %c64 = arith.constant 64 : index
    %40 = vector.load %arg10[%c0_27, %c64] : memref<8x128xf32, #tpu.memory_space<vmem>>, vector<8x32xf32>
    %c0_28 = arith.constant 0 : index
    %c96 = arith.constant 96 : index
    %41 = vector.load %arg10[%c0_28, %c96] : memref<8x128xf32, #tpu.memory_space<vmem>>, vector<8x32xf32>
    %42 = arith.mulf %39, %25 : vector<8x32xf32>
    %43 = arith.mulf %38, %40 : vector<8x32xf32>
    %44 = arith.addf %42, %43 : vector<8x32xf32>
    %45 = math.tanh %44 : vector<8x32xf32>
    %46 = arith.mulf %41, %45 : vector<8x32xf32>
    %c0_29 = arith.constant 0 : index
    %c0_30 = arith.constant 0 : index
    %47 = vector.load %arg8[%c0_29, %c0_30] : memref<64x32xf32, #tpu.memory_space<vmem>>, vector<8x32xf32>
    tpu.vector_store %arg8[%c0_29, %c0_30], %46 {strides = array<i32>} : memref<64x32xf32, #tpu.memory_space<vmem>>, vector<8x32xf32>,
    %c8 = arith.constant 8 : index
    %c0_31 = arith.constant 0 : index
    %48 = vector.load %arg9[%c8, %c0_31] : memref<64x128xf32, #tpu.memory_space<vmem>>, vector<8x128xf32>
    %49 = arith.truncf %46 : vector<8x32xf32> to vector<8x32xbf16>
    %cst_32 = arith.constant dense<0.000000e+00> : vector<8x128xf32>
    %50 = tpu.matmul %49, %14, %cst_32 {dimension_numbers = #tpu.dot_dimension_numbers<[1], [0], [0], [1], [0, 0, 1, 1], [], []>} : vector<8x32xbf16>, vector<32x128xbf16>, vector<8x128xf32> -> vector<8x128xf32>
    %51 = arith.addf %48, %50 : vector<8x128xf32>
    %52 = arith.mulf %51, %23 : vector<8x128xf32>
    %53 = math.tanh %52 : vector<8x128xf32>
    %cst_33 = arith.constant 5.000000e-01 : f32
    %54 = vector.broadcast %cst_33 : f32 to vector<8x128xf32>
    %55 = arith.mulf %54, %53 : vector<8x128xf32>
    %cst_34 = arith.constant 5.000000e-01 : f32
    %56 = vector.broadcast %cst_34 : f32 to vector<8x128xf32>
    %57 = arith.addf %55, %56 : vector<8x128xf32>
    %58 = arith.select %20, %53, %57 : vector<8x128xi1>, vector<8x128xf32>
    %c0_35 = arith.constant 0 : index
    %c0_36 = arith.constant 0 : index
    %59 = vector.load %arg10[%c0_35, %c0_36] : memref<8x128xf32, #tpu.memory_space<vmem>>, vector<8x128xf32>
    tpu.vector_store %arg10[%c0_35, %c0_36], %58 {strides = array<i32>} : memref<8x128xf32, #tpu.memory_space<vmem>>, vector<8x128xf32>,
    %c0_37 = arith.constant 0 : index
    %c0_38 = arith.constant 0 : index
    %60 = vector.load %arg10[%c0_37, %c0_38] : memref<8x128xf32, #tpu.memory_space<vmem>>, vector<8x32xf32>
    %c0_39 = arith.constant 0 : index
    %c32_40 = arith.constant 32 : index
    %61 = vector.load %arg10[%c0_39, %c32_40] : memref<8x128xf32, #tpu.memory_space<vmem>>, vector<8x32xf32>
    %c0_41 = arith.constant 0 : index
    %c64_42 = arith.constant 64 : index
    %62 = vector.load %arg10[%c0_41, %c64_42] : memref<8x128xf32, #tpu.memory_space<vmem>>, vector<8x32xf32>
    %c0_43 = arith.constant 0 : index
    %c96_44 = arith.constant 96 : index
    %63 = vector.load %arg10[%c0_43, %c96_44] : memref<8x128xf32, #tpu.memory_space<vmem>>, vector<8x32xf32>
    %64 = arith.mulf %61, %44 : vector<8x32xf32>
    %65 = arith.mulf %60, %62 : vector<8x32xf32>
    %66 = arith.addf %64, %65 : vector<8x32xf32>
    %67 = math.tanh %66 : vector<8x32xf32>
    %68 = arith.mulf %63, %67 : vector<8x32xf32>
    %c8_45 = arith.constant 8 : index
    %c0_46 = arith.constant 0 : index
    %69 = vector.load %arg8[%c8_45, %c0_46] : memref<64x32xf32, #tpu.memory_space<vmem>>, vector<8x32xf32>
    tpu.vector_store %arg8[%c8_45, %c0_46], %68 {strides = array<i32>} : memref<64x32xf32, #tpu.memory_space<vmem>>, vector<8x32xf32>,
    %c16 = arith.constant 16 : index
    %c0_47 = arith.constant 0 : index
    %70 = vector.load %arg9[%c16, %c0_47] : memref<64x128xf32, #tpu.memory_space<vmem>>, vector<8x128xf32>
    %71 = arith.truncf %68 : vector<8x32xf32> to vector<8x32xbf16>
    %cst_48 = arith.constant dense<0.000000e+00> : vector<8x128xf32>
    %72 = tpu.matmul %71, %14, %cst_48 {dimension_numbers = #tpu.dot_dimension_numbers<[1], [0], [0], [1], [0, 0, 1, 1], [], []>} : vector<8x32xbf16>, vector<32x128xbf16>, vector<8x128xf32> -> vector<8x128xf32>
    %73 = arith.addf %70, %72 : vector<8x128xf32>
    %74 = arith.mulf %73, %23 : vector<8x128xf32>
    %75 = math.tanh %74 : vector<8x128xf32>
    %cst_49 = arith.constant 5.000000e-01 : f32
    %76 = vector.broadcast %cst_49 : f32 to vector<8x128xf32>
    %77 = arith.mulf %76, %75 : vector<8x128xf32>
    %cst_50 = arith.constant 5.000000e-01 : f32
    %78 = vector.broadcast %cst_50 : f32 to vector<8x128xf32>
    %79 = arith.addf %77, %78 : vector<8x128xf32>
    %80 = arith.select %20, %75, %79 : vector<8x128xi1>, vector<8x128xf32>
    %c0_51 = arith.constant 0 : index
    %c0_52 = arith.constant 0 : index
    %81 = vector.load %arg10[%c0_51, %c0_52] : memref<8x128xf32, #tpu.memory_space<vmem>>, vector<8x128xf32>
    tpu.vector_store %arg10[%c0_51, %c0_52], %80 {strides = array<i32>} : memref<8x128xf32, #tpu.memory_space<vmem>>, vector<8x128xf32>,
    %c0_53 = arith.constant 0 : index
    %c0_54 = arith.constant 0 : index
    %82 = vector.load %arg10[%c0_53, %c0_54] : memref<8x128xf32, #tpu.memory_space<vmem>>, vector<8x32xf32>
    %c0_55 = arith.constant 0 : index
    %c32_56 = arith.constant 32 : index
    %83 = vector.load %arg10[%c0_55, %c32_56] : memref<8x128xf32, #tpu.memory_space<vmem>>, vector<8x32xf32>
    %c0_57 = arith.constant 0 : index
    %c64_58 = arith.constant 64 : index
    %84 = vector.load %arg10[%c0_57, %c64_58] : memref<8x128xf32, #tpu.memory_space<vmem>>, vector<8x32xf32>
    %c0_59 = arith.constant 0 : index
    %c96_60 = arith.constant 96 : index
    %85 = vector.load %arg10[%c0_59, %c96_60] : memref<8x128xf32, #tpu.memory_space<vmem>>, vector<8x32xf32>
    %86 = arith.mulf %83, %66 : vector<8x32xf32>
    %87 = arith.mulf %82, %84 : vector<8x32xf32>
    %88 = arith.addf %86, %87 : vector<8x32xf32>
    %89 = math.tanh %88 : vector<8x32xf32>
    %90 = arith.mulf %85, %89 : vector<8x32xf32>
    %c16_61 = arith.constant 16 : index
    %c0_62 = arith.constant 0 : index
    %91 = vector.load %arg8[%c16_61, %c0_62] : memref<64x32xf32, #tpu.memory_space<vmem>>, vector<8x32xf32>
    tpu.vector_store %arg8[%c16_61, %c0_62], %90 {strides = array<i32>} : memref<64x32xf32, #tpu.memory_space<vmem>>, vector<8x32xf32>,
    %c24 = arith.constant 24 : index
    %c0_63 = arith.constant 0 : index
    %92 = vector.load %arg9[%c24, %c0_63] : memref<64x128xf32, #tpu.memory_space<vmem>>, vector<8x128xf32>
    %93 = arith.truncf %90 : vector<8x32xf32> to vector<8x32xbf16>
    %cst_64 = arith.constant dense<0.000000e+00> : vector<8x128xf32>
    %94 = tpu.matmul %93, %14, %cst_64 {dimension_numbers = #tpu.dot_dimension_numbers<[1], [0], [0], [1], [0, 0, 1, 1], [], []>} : vector<8x32xbf16>, vector<32x128xbf16>, vector<8x128xf32> -> vector<8x128xf32>
    %95 = arith.addf %92, %94 : vector<8x128xf32>
    %96 = arith.mulf %95, %23 : vector<8x128xf32>
    %97 = math.tanh %96 : vector<8x128xf32>
    %cst_65 = arith.constant 5.000000e-01 : f32
    %98 = vector.broadcast %cst_65 : f32 to vector<8x128xf32>
    %99 = arith.mulf %98, %97 : vector<8x128xf32>
    %cst_66 = arith.constant 5.000000e-01 : f32
    %100 = vector.broadcast %cst_66 : f32 to vector<8x128xf32>
    %101 = arith.addf %99, %100 : vector<8x128xf32>
    %102 = arith.select %20, %97, %101 : vector<8x128xi1>, vector<8x128xf32>
    %c0_67 = arith.constant 0 : index
    %c0_68 = arith.constant 0 : index
    %103 = vector.load %arg10[%c0_67, %c0_68] : memref<8x128xf32, #tpu.memory_space<vmem>>, vector<8x128xf32>
    tpu.vector_store %arg10[%c0_67, %c0_68], %102 {strides = array<i32>} : memref<8x128xf32, #tpu.memory_space<vmem>>, vector<8x128xf32>,
    %c0_69 = arith.constant 0 : index
    %c0_70 = arith.constant 0 : index
    %104 = vector.load %arg10[%c0_69, %c0_70] : memref<8x128xf32, #tpu.memory_space<vmem>>, vector<8x32xf32>
    %c0_71 = arith.constant 0 : index
    %c32_72 = arith.constant 32 : index
    %105 = vector.load %arg10[%c0_71, %c32_72] : memref<8x128xf32, #tpu.memory_space<vmem>>, vector<8x32xf32>
    %c0_73 = arith.constant 0 : index
    %c64_74 = arith.constant 64 : index
    %106 = vector.load %arg10[%c0_73, %c64_74] : memref<8x128xf32, #tpu.memory_space<vmem>>, vector<8x32xf32>
    %c0_75 = arith.constant 0 : index
    %c96_76 = arith.constant 96 : index
    %107 = vector.load %arg10[%c0_75, %c96_76] : memref<8x128xf32, #tpu.memory_space<vmem>>, vector<8x32xf32>
    %108 = arith.mulf %105, %88 : vector<8x32xf32>
    %109 = arith.mulf %104, %106 : vector<8x32xf32>
    %110 = arith.addf %108, %109 : vector<8x32xf32>
    %111 = math.tanh %110 : vector<8x32xf32>
    %112 = arith.mulf %107, %111 : vector<8x32xf32>
    %c24_77 = arith.constant 24 : index
    %c0_78 = arith.constant 0 : index
    %113 = vector.load %arg8[%c24_77, %c0_78] : memref<64x32xf32, #tpu.memory_space<vmem>>, vector<8x32xf32>
    tpu.vector_store %arg8[%c24_77, %c0_78], %112 {strides = array<i32>} : memref<64x32xf32, #tpu.memory_space<vmem>>, vector<8x32xf32>,
    %c32_79 = arith.constant 32 : index
    %c0_80 = arith.constant 0 : index
    %114 = vector.load %arg9[%c32_79, %c0_80] : memref<64x128xf32, #tpu.memory_space<vmem>>, vector<8x128xf32>
    %115 = arith.truncf %112 : vector<8x32xf32> to vector<8x32xbf16>
    %cst_81 = arith.constant dense<0.000000e+00> : vector<8x128xf32>
    %116 = tpu.matmul %115, %14, %cst_81 {dimension_numbers = #tpu.dot_dimension_numbers<[1], [0], [0], [1], [0, 0, 1, 1], [], []>} : vector<8x32xbf16>, vector<32x128xbf16>, vector<8x128xf32> -> vector<8x128xf32>
    %117 = arith.addf %114, %116 : vector<8x128xf32>
    %118 = arith.mulf %117, %23 : vector<8x128xf32>
    %119 = math.tanh %118 : vector<8x128xf32>
    %cst_82 = arith.constant 5.000000e-01 : f32
    %120 = vector.broadcast %cst_82 : f32 to vector<8x128xf32>
    %121 = arith.mulf %120, %119 : vector<8x128xf32>
    %cst_83 = arith.constant 5.000000e-01 : f32
    %122 = vector.broadcast %cst_83 : f32 to vector<8x128xf32>
    %123 = arith.addf %121, %122 : vector<8x128xf32>
    %124 = arith.select %20, %119, %123 : vector<8x128xi1>, vector<8x128xf32>
    %c0_84 = arith.constant 0 : index
    %c0_85 = arith.constant 0 : index
    %125 = vector.load %arg10[%c0_84, %c0_85] : memref<8x128xf32, #tpu.memory_space<vmem>>, vector<8x128xf32>
    tpu.vector_store %arg10[%c0_84, %c0_85], %124 {strides = array<i32>} : memref<8x128xf32, #tpu.memory_space<vmem>>, vector<8x128xf32>,
    %c0_86 = arith.constant 0 : index
    %c0_87 = arith.constant 0 : index
    %126 = vector.load %arg10[%c0_86, %c0_87] : memref<8x128xf32, #tpu.memory_space<vmem>>, vector<8x32xf32>
    %c0_88 = arith.constant 0 : index
    %c32_89 = arith.constant 32 : index
    %127 = vector.load %arg10[%c0_88, %c32_89] : memref<8x128xf32, #tpu.memory_space<vmem>>, vector<8x32xf32>
    %c0_90 = arith.constant 0 : index
    %c64_91 = arith.constant 64 : index
    %128 = vector.load %arg10[%c0_90, %c64_91] : memref<8x128xf32, #tpu.memory_space<vmem>>, vector<8x32xf32>
    %c0_92 = arith.constant 0 : index
    %c96_93 = arith.constant 96 : index
    %129 = vector.load %arg10[%c0_92, %c96_93] : memref<8x128xf32, #tpu.memory_space<vmem>>, vector<8x32xf32>
    %130 = arith.mulf %127, %110 : vector<8x32xf32>
    %131 = arith.mulf %126, %128 : vector<8x32xf32>
    %132 = arith.addf %130, %131 : vector<8x32xf32>
    %133 = math.tanh %132 : vector<8x32xf32>
    %134 = arith.mulf %129, %133 : vector<8x32xf32>
    %c32_94 = arith.constant 32 : index
    %c0_95 = arith.constant 0 : index
    %135 = vector.load %arg8[%c32_94, %c0_95] : memref<64x32xf32, #tpu.memory_space<vmem>>, vector<8x32xf32>
    tpu.vector_store %arg8[%c32_94, %c0_95], %134 {strides = array<i32>} : memref<64x32xf32, #tpu.memory_space<vmem>>, vector<8x32xf32>,
    %c40 = arith.constant 40 : index
    %c0_96 = arith.constant 0 : index
    %136 = vector.load %arg9[%c40, %c0_96] : memref<64x128xf32, #tpu.memory_space<vmem>>, vector<8x128xf32>
    %137 = arith.truncf %134 : vector<8x32xf32> to vector<8x32xbf16>
    %cst_97 = arith.constant dense<0.000000e+00> : vector<8x128xf32>
    %138 = tpu.matmul %137, %14, %cst_97 {dimension_numbers = #tpu.dot_dimension_numbers<[1], [0], [0], [1], [0, 0, 1, 1], [], []>} : vector<8x32xbf16>, vector<32x128xbf16>, vector<8x128xf32> -> vector<8x128xf32>
    %139 = arith.addf %136, %138 : vector<8x128xf32>
    %140 = arith.mulf %139, %23 : vector<8x128xf32>
    %141 = math.tanh %140 : vector<8x128xf32>
    %cst_98 = arith.constant 5.000000e-01 : f32
    %142 = vector.broadcast %cst_98 : f32 to vector<8x128xf32>
    %143 = arith.mulf %142, %141 : vector<8x128xf32>
    %cst_99 = arith.constant 5.000000e-01 : f32
    %144 = vector.broadcast %cst_99 : f32 to vector<8x128xf32>
    %145 = arith.addf %143, %144 : vector<8x128xf32>
    %146 = arith.select %20, %141, %145 : vector<8x128xi1>, vector<8x128xf32>
    %c0_100 = arith.constant 0 : index
    %c0_101 = arith.constant 0 : index
    %147 = vector.load %arg10[%c0_100, %c0_101] : memref<8x128xf32, #tpu.memory_space<vmem>>, vector<8x128xf32>
    tpu.vector_store %arg10[%c0_100, %c0_101], %146 {strides = array<i32>} : memref<8x128xf32, #tpu.memory_space<vmem>>, vector<8x128xf32>,
    %c0_102 = arith.constant 0 : index
    %c0_103 = arith.constant 0 : index
    %148 = vector.load %arg10[%c0_102, %c0_103] : memref<8x128xf32, #tpu.memory_space<vmem>>, vector<8x32xf32>
    %c0_104 = arith.constant 0 : index
    %c32_105 = arith.constant 32 : index
    %149 = vector.load %arg10[%c0_104, %c32_105] : memref<8x128xf32, #tpu.memory_space<vmem>>, vector<8x32xf32>
    %c0_106 = arith.constant 0 : index
    %c64_107 = arith.constant 64 : index
    %150 = vector.load %arg10[%c0_106, %c64_107] : memref<8x128xf32, #tpu.memory_space<vmem>>, vector<8x32xf32>
    %c0_108 = arith.constant 0 : index
    %c96_109 = arith.constant 96 : index
    %151 = vector.load %arg10[%c0_108, %c96_109] : memref<8x128xf32, #tpu.memory_space<vmem>>, vector<8x32xf32>
    %152 = arith.mulf %149, %132 : vector<8x32xf32>
    %153 = arith.mulf %148, %150 : vector<8x32xf32>
    %154 = arith.addf %152, %153 : vector<8x32xf32>
    %155 = math.tanh %154 : vector<8x32xf32>
    %156 = arith.mulf %151, %155 : vector<8x32xf32>
    %c40_110 = arith.constant 40 : index
    %c0_111 = arith.constant 0 : index
    %157 = vector.load %arg8[%c40_110, %c0_111] : memref<64x32xf32, #tpu.memory_space<vmem>>, vector<8x32xf32>
    tpu.vector_store %arg8[%c40_110, %c0_111], %156 {strides = array<i32>} : memref<64x32xf32, #tpu.memory_space<vmem>>, vector<8x32xf32>,
    %c48 = arith.constant 48 : index
    %c0_112 = arith.constant 0 : index
    %158 = vector.load %arg9[%c48, %c0_112] : memref<64x128xf32, #tpu.memory_space<vmem>>, vector<8x128xf32>
    %159 = arith.truncf %156 : vector<8x32xf32> to vector<8x32xbf16>
    %cst_113 = arith.constant dense<0.000000e+00> : vector<8x128xf32>
    %160 = tpu.matmul %159, %14, %cst_113 {dimension_numbers = #tpu.dot_dimension_numbers<[1], [0], [0], [1], [0, 0, 1, 1], [], []>} : vector<8x32xbf16>, vector<32x128xbf16>, vector<8x128xf32> -> vector<8x128xf32>
    %161 = arith.addf %158, %160 : vector<8x128xf32>
    %162 = arith.mulf %161, %23 : vector<8x128xf32>
    %163 = math.tanh %162 : vector<8x128xf32>
    %cst_114 = arith.constant 5.000000e-01 : f32
    %164 = vector.broadcast %cst_114 : f32 to vector<8x128xf32>
    %165 = arith.mulf %164, %163 : vector<8x128xf32>
    %cst_115 = arith.constant 5.000000e-01 : f32
    %166 = vector.broadcast %cst_115 : f32 to vector<8x128xf32>
    %167 = arith.addf %165, %166 : vector<8x128xf32>
    %168 = arith.select %20, %163, %167 : vector<8x128xi1>, vector<8x128xf32>
    %c0_116 = arith.constant 0 : index
    %c0_117 = arith.constant 0 : index
    %169 = vector.load %arg10[%c0_116, %c0_117] : memref<8x128xf32, #tpu.memory_space<vmem>>, vector<8x128xf32>
    tpu.vector_store %arg10[%c0_116, %c0_117], %168 {strides = array<i32>} : memref<8x128xf32, #tpu.memory_space<vmem>>, vector<8x128xf32>,
    %c0_118 = arith.constant 0 : index
    %c0_119 = arith.constant 0 : index
    %170 = vector.load %arg10[%c0_118, %c0_119] : memref<8x128xf32, #tpu.memory_space<vmem>>, vector<8x32xf32>
    %c0_120 = arith.constant 0 : index
    %c32_121 = arith.constant 32 : index
    %171 = vector.load %arg10[%c0_120, %c32_121] : memref<8x128xf32, #tpu.memory_space<vmem>>, vector<8x32xf32>
    %c0_122 = arith.constant 0 : index
    %c64_123 = arith.constant 64 : index
    %172 = vector.load %arg10[%c0_122, %c64_123] : memref<8x128xf32, #tpu.memory_space<vmem>>, vector<8x32xf32>
    %c0_124 = arith.constant 0 : index
    %c96_125 = arith.constant 96 : index
    %173 = vector.load %arg10[%c0_124, %c96_125] : memref<8x128xf32, #tpu.memory_space<vmem>>, vector<8x32xf32>
    %174 = arith.mulf %171, %154 : vector<8x32xf32>
    %175 = arith.mulf %170, %172 : vector<8x32xf32>
    %176 = arith.addf %174, %175 : vector<8x32xf32>
    %177 = math.tanh %176 : vector<8x32xf32>
    %178 = arith.mulf %173, %177 : vector<8x32xf32>
    %c48_126 = arith.constant 48 : index
    %c0_127 = arith.constant 0 : index
    %179 = vector.load %arg8[%c48_126, %c0_127] : memref<64x32xf32, #tpu.memory_space<vmem>>, vector<8x32xf32>
    tpu.vector_store %arg8[%c48_126, %c0_127], %178 {strides = array<i32>} : memref<64x32xf32, #tpu.memory_space<vmem>>, vector<8x32xf32>,
    %c56 = arith.constant 56 : index
    %c0_128 = arith.constant 0 : index
    %180 = vector.load %arg9[%c56, %c0_128] : memref<64x128xf32, #tpu.memory_space<vmem>>, vector<8x128xf32>
    %181 = arith.truncf %178 : vector<8x32xf32> to vector<8x32xbf16>
    %cst_129 = arith.constant dense<0.000000e+00> : vector<8x128xf32>
    %182 = tpu.matmul %181, %14, %cst_129 {dimension_numbers = #tpu.dot_dimension_numbers<[1], [0], [0], [1], [0, 0, 1, 1], [], []>} : vector<8x32xbf16>, vector<32x128xbf16>, vector<8x128xf32> -> vector<8x128xf32>
    %183 = arith.addf %180, %182 : vector<8x128xf32>
    %184 = arith.mulf %183, %23 : vector<8x128xf32>
    %185 = math.tanh %184 : vector<8x128xf32>
    %cst_130 = arith.constant 5.000000e-01 : f32
    %186 = vector.broadcast %cst_130 : f32 to vector<8x128xf32>
    %187 = arith.mulf %186, %185 : vector<8x128xf32>
    %cst_131 = arith.constant 5.000000e-01 : f32
    %188 = vector.broadcast %cst_131 : f32 to vector<8x128xf32>
    %189 = arith.addf %187, %188 : vector<8x128xf32>
    %190 = arith.select %20, %185, %189 : vector<8x128xi1>, vector<8x128xf32>
    %c0_132 = arith.constant 0 : index
    %c0_133 = arith.constant 0 : index
    %191 = vector.load %arg10[%c0_132, %c0_133] : memref<8x128xf32, #tpu.memory_space<vmem>>, vector<8x128xf32>
    tpu.vector_store %arg10[%c0_132, %c0_133], %190 {strides = array<i32>} : memref<8x128xf32, #tpu.memory_space<vmem>>, vector<8x128xf32>,
    %c0_134 = arith.constant 0 : index
    %c0_135 = arith.constant 0 : index
    %192 = vector.load %arg10[%c0_134, %c0_135] : memref<8x128xf32, #tpu.memory_space<vmem>>, vector<8x32xf32>
    %c0_136 = arith.constant 0 : index
    %c32_137 = arith.constant 32 : index
    %193 = vector.load %arg10[%c0_136, %c32_137] : memref<8x128xf32, #tpu.memory_space<vmem>>, vector<8x32xf32>
    %c0_138 = arith.constant 0 : index
    %c64_139 = arith.constant 64 : index
    %194 = vector.load %arg10[%c0_138, %c64_139] : memref<8x128xf32, #tpu.memory_space<vmem>>, vector<8x32xf32>
    %c0_140 = arith.constant 0 : index
    %c96_141 = arith.constant 96 : index
    %195 = vector.load %arg10[%c0_140, %c96_141] : memref<8x128xf32, #tpu.memory_space<vmem>>, vector<8x32xf32>
    %196 = arith.mulf %193, %176 : vector<8x32xf32>
    %197 = arith.mulf %192, %194 : vector<8x32xf32>
    %198 = arith.addf %196, %197 : vector<8x32xf32>
    %199 = math.tanh %198 : vector<8x32xf32>
    %200 = arith.mulf %195, %199 : vector<8x32xf32>
    %c56_142 = arith.constant 56 : index
    %c0_143 = arith.constant 0 : index
    %201 = vector.load %arg8[%c56_142, %c0_143] : memref<64x32xf32, #tpu.memory_space<vmem>>, vector<8x32xf32>
    tpu.vector_store %arg8[%c56_142, %c0_143], %200 {strides = array<i32>} : memref<64x32xf32, #tpu.memory_space<vmem>>, vector<8x32xf32>,
    %c1_i32 = arith.constant 1 : i32
    %202 = arith.cmpi eq, %arg0, %c1_i32 : i32
    %203 = arith.extui %202 : i1 to i32
    %c0_i32_144 = arith.constant 0 : i32
    %204 = arith.cmpi ne, %203, %c0_i32_144 : i32
    scf.if %204 {
      %205 = arith.truncf %200 : vector<8x32xf32> to vector<8x32xbf16>
      %c0_145 = arith.constant 0 : index
      %c0_146 = arith.constant 0 : index
      %206 = vector.load %arg5[%c0_145, %c0_146] : memref<32x128xbf16, #tpu.memory_space<vmem>>, vector<32x128xbf16>
      %cst_147 = arith.constant dense<0.000000e+00> : vector<8x128xf32>
      %207 = tpu.matmul %205, %206, %cst_147 {dimension_numbers = #tpu.dot_dimension_numbers<[1], [0], [0], [1], [0, 0, 1, 1], [], []>} : vector<8x32xbf16>, vector<32x128xbf16>, vector<8x128xf32> -> vector<8x128xf32>
      %c0_148 = arith.constant 0 : index
      %c0_149 = arith.constant 0 : index
      %208 = vector.load %arg6[%c0_148, %c0_149] : memref<1x128xf32, #tpu.memory_space<vmem>>, vector<1x128xf32>
      %209 = vector.broadcast %208 : vector<1x128xf32> to vector<8x128xf32>
      %210 = arith.addf %207, %209 : vector<8x128xf32>
      %c0_150 = arith.constant 0 : index
      %c0_151 = arith.constant 0 : index
      %211 = vector.load %arg7[%c0_150, %c0_151] : memref<8x128xf32, #tpu.memory_space<vmem>>, vector<8x128xf32>
      tpu.vector_store %arg7[%c0_150, %c0_151], %210 {strides = array<i32>} : memref<8x128xf32, #tpu.memory_space<vmem>>, vector<8x128xf32>,
    } else {
    }
    return
  }
  func.func @transform_0(%arg0: i32) -> (i32, i32) {
    %c0_i32 = arith.constant 0 : i32
    %c0_i32_0 = arith.constant 0 : i32
    %c0_i32_1 = arith.constant 0 : i32
    return %c0_i32, %c0_i32_0 : i32, i32
  }
  func.func @transform_1(%arg0: i32) -> (i32, i32, i32) {
    %c0_i32 = arith.constant 0 : i32
    %c0_i32_0 = arith.constant 0 : i32
    %c0_i32_1 = arith.constant 0 : i32
    return %arg0, %c0_i32, %c0_i32_0 : i32, i32, i32
  }
  func.func @transform_2(%arg0: i32) -> (i32, i32, i32) {
    %c0_i32 = arith.constant 0 : i32
    %c0_i32_0 = arith.constant 0 : i32
    %c0_i32_1 = arith.constant 0 : i32
    return %arg0, %c0_i32, %c0_i32_0 : i32, i32, i32
  }
  func.func @transform_3(%arg0: i32) -> (i32, i32, i32) {
    %c0_i32 = arith.constant 0 : i32
    %c0_i32_0 = arith.constant 0 : i32
    %c0_i32_1 = arith.constant 0 : i32
    return %arg0, %c0_i32, %c0_i32_0 : i32, i32, i32
  }
  func.func @transform_4(%arg0: i32) -> (i32, i32) {
    %c0_i32 = arith.constant 0 : i32
    %c0_i32_0 = arith.constant 0 : i32
    %c0_i32_1 = arith.constant 0 : i32
    return %c0_i32, %c0_i32_0 : i32, i32
  }
  func.func @transform_5(%arg0: i32) -> (i32, i32) {
    %c0_i32 = arith.constant 0 : i32
    %c0_i32_0 = arith.constant 0 : i32
    %c0_i32_1 = arith.constant 0 : i32
    return %c0_i32, %c0_i32_0 : i32, i32
  }
  func.func @transform_6(%arg0: i32) -> (i32, i32) {
    %c0_i32 = arith.constant 0 : i32
    %c0_i32_0 = arith.constant 0 : i32
    %c0_i32_1 = arith.constant 0 : i32
    return %c0_i32, %c0_i32_0 : i32, i32
  }
}

</mosaic_0001>

<bundles_post_ra>
// kernel: tpu_custom_call.1
= control target key start
LH: loop header
LB: loop body
LE: loop exit
PB: predicated region body
PF: predicated region fallthrough
CT: control target
= control target key end

     0   :  { %11 = vsyncpa [#allocation6], 0  ;;  %s1497_s21 = smov 0   ;;  %s1789_s0 = inlined_call_operand.vmem [shape: f32[64,32], index: 0, kind: input, shape index: {}]   ;;  %s1790_s1 = inlined_call_operand.vmem [shape: bf16[2,32,128], index: 1, kind: input, shape index: {}]   ;;  %s1791_s2 = inlined_call_operand.vmem [shape: bf16[2,32,128], index: 2, kind: input, shape index: {}]   ;;  %s1792_s3 = inlined_call_operand.vmem [shape: f32[2,1,128], index: 3, kind: input, shape index: {}]   ;;  %s1793_s4 = inlined_call_operand.vmem [shape: bf16[32,128], index: 4, kind: input, shape index: {}]   ;;  %s1794_s5 = inlined_call_operand.vmem [shape: f32[1,128], index: 5, kind: input, shape index: {}]   ;;  %s1795_s6 = inlined_call_operand.hbm [shape: f32[8,128], index: 6, kind: output, shape index: {}]  }
   0x1 LB: > { %s1503_s22 = sadd.s32 4294967295, %s1450_s21   ;;  %p1202_p0 = scmp.ge.s32.totalorder %s1450_s21, 1  ;;  %s1450_s21 = sphi %s1497_s21, %s17_s21  }
   0x2   : > { %p226_p1 = scmp.lt.s32.totalorder %s1450_s21, 3 }
   0x4   : > { %p227_p2 = pnand %p1202_p0, %p226_p1 }
   0x5   : > { %p259_p3 = scmp.lt.s32.totalorder (!%p227_p2), %s1503_s22, 1  ;;  %p1207_p4 = scmp.ne.s32.totalorder (!%p227_p2), %s1503_s22, 0 }
   0x6   : > { %230 = sbr.rel (%p227_p2) target bundleno = 5963 (0x174b), region = 44 }
   0xd   : > { %s1509_s23 = scalar_select %p259_p3, %s1503_s22, 1 }
   0xe   : > { %276 = sbr.rel (%p1207_p4) target bundleno = 21 (0x15), region = 48  ;;  %v277_v0 = vld [vmem:[%s1789_s0] sm:$0xff] (!%p1207_p4)  ;;  %vm285_vm0 = vcmask (!%p1207_p4), 261120   ;;  %v278_v1 = vld [vmem:[%s1789_s0 + $0x8] sm:$0xff] (!%p1207_p4)  ;;  %v279_v2 = vld [vmem:[%s1789_s0 + $0x10] sm:$0xff] (!%p1207_p4) }
   0xf   : > { %s1233_s24 = sshll.u32 %s1509_s23, 4  ;;  %s271_s27 = scalar_lea.vmem %s1792_s3, %s1509_s23  ;;  %286 = vst.msk [vmem:[#allocation2] sm:$0xff] (!%p1207_p4), %vm285_vm0, %v277_v0  ;;  %287 = vst.msk [vmem:[#allocation2 + $0x8] sm:$0xff] (!%p1207_p4), %vm285_vm0, %v278_v1  ;;  %v280_v3 = vld [vmem:[%s1789_s0 + $0x18] sm:$0xff] (!%p1207_p4)  ;;  %v281_v4 = vld [vmem:[%s1789_s0 + $0x20] sm:$0xff] (!%p1207_p4) }
  0x10   : > { %s263_s30 = scalar_lea.vmem %s1790_s1, %s1233_s24  ;;  %s268_s9 = scalar_lea.vmem %s1791_s2, %s1233_s24  ;;  %288 = vst.msk [vmem:[#allocation2 + $0x10] sm:$0xff] (!%p1207_p4), %vm285_vm0, %v279_v2  ;;  %v282_v5 = vld [vmem:[%s1789_s0 + $0x28] sm:$0xff] (!%p1207_p4)  ;;  %289 = vst.msk [vmem:[#allocation2 + $0x18] sm:$0xff] (!%p1207_p4), %vm285_vm0, %v280_v3  ;;  %v283_v6 = vld [vmem:[%s1789_s0 + $0x30] sm:$0xff] (!%p1207_p4) }
  0x11   : > { %290 = vst.msk [vmem:[#allocation2 + $0x20] sm:$0xff] (!%p1207_p4), %vm285_vm0, %v281_v4  ;;  %291 = vst.msk [vmem:[#allocation2 + $0x28] sm:$0xff] (!%p1207_p4), %vm285_vm0, %v282_v5  ;;  %v284_v7 = vld [vmem:[%s1789_s0 + $0x38] sm:$0xff] (!%p1207_p4) }
  0x12   : > { %292 = vst.msk [vmem:[#allocation2 + $0x30] sm:$0xff] (!%p1207_p4), %vm285_vm0, %v283_v6  ;;  %293 = vst.msk [vmem:[#allocation2 + $0x38] sm:$0xff] (!%p1207_p4), %vm285_vm0, %v284_v7 }
  0x15 PF: > { %v1376_v8 = vld [vmem:[%s263_s30] sm:$0xff]   ;;  %v1452_v9 = vmov 0.0   ;;  %v1378_v11 = vld [vmem:[%s263_s30 + $0x8] sm:$0xff]   ;;  %vm329_vm1 = vcmask 261120   ;;  %vm1453_vm2 = vmmov 0   ;;  %v1454_v19 = vmov 0  }
  0x16   : > { %1280 = vmatprep.subr.bf16.mxu1 %v1452_v9  ;;  %v1548_v10 = vld [vmem:[%s268_s9] sm:$0xff]   ;;  %1268 = vmatprep.subr.bf16.mxu0 %v1376_v8  ;;  %v1551_v12 = vld [vmem:[%s268_s9 + $0x8] sm:$0xff]   ;;  %v419_v20 = vlaneseq  ;;  %v1455_v31 = vmov 0.5   ;;  %s1456_s23 = smov 64   ;;  %p1224_p5 = scmp.ne.s32.totalorder %s1503_s22, 1 }
  0x17   : > { %1269 = vmatpush3.bf16.msra.mxu0 %v1376_v8  ;;  %1281 = vmatpush3.bf16.msra.mxu1 %v1548_v10  ;;  %v294_v13 = vld [vmem:[#allocation2] sm:$0xff]  ;;  %v295_v14 = vld [vmem:[#allocation2 + $0x8] sm:$0xff]  ;;  %v296_v15 = vld [vmem:[#allocation2 + $0x10] sm:$0xff]  ;;  %s1459_s10 = smov (!%p1224_p5), 32   ;;  %vm1460_vm6 = vmmov (!%p1224_p5), 0  }
  0x18   : > { %1270 = vmatprep.subr.bf16.mxu0 %v1378_v11  ;;  %1282 = vmatprep.subr.bf16.mxu1 %v1452_v9  ;;  %v302_v16 = vpack.c.bf16 %v295_v14, %v294_v13  ;;  %v297_v17 = vld [vmem:[#allocation2 + $0x18] sm:$0xff]  ;;  %v420_v21 = vand.u32 127, %v419_v20  ;;  %v1576_v22 = vld [vmem:[%s271_s27] ss:$0 sm:$0xff]  ;;  %s1457_s27 = smov 32   ;;  %v299_v4 = vld [vmem:[#allocation2 + $0x28] sm:$0xff] }
  0x19   : > { %1284 = vmatprep.mubr.msk.bf16.mxu1 %vm1453_vm2, %v1452_v9  ;;  %v303_v18 = vpack.c.bf16 %v297_v17, %v296_v15  ;;  %v298_v3 = vld [vmem:[#allocation2 + $0x20] sm:$0xff]  ;;  %v300_v5 = vld [vmem:[#allocation2 + $0x30] sm:$0xff]  ;;  %v301_v7 = vld [vmem:[#allocation2 + $0x38] sm:$0xff] }
  0x1a   : > { %1272 = vmatprep.mubr.msk.bf16.mxu0 %vm329_vm1, %v302_v16  ;;  %vm421_vm3 = vcmp.ge.s32.totalorder %v420_v21, 64  ;;  %vm422_vm4 = vcmp.lt.s32.totalorder %v420_v21, 96  ;;  %v304_v6 = vpack.c.bf16 %v299_v4, %v298_v3  ;;  %v305_v8 = vpack.c.bf16 %v301_v7, %v300_v5 }
  0x1b   : > { %1271 = vmatpush3.bf16.msra.mxu0 %v1378_v11  ;;  %1283 = vmatpush3.bf16.msra.mxu1 %v1551_v12  ;;  %vm1580_vm5 = vmand %vm421_vm3, %vm422_vm4 }
  0x1c   : > { %1288 = vmatprep.subr.bf16.mxu1 %v1452_v9  ;;  %1296 = vmatprep.subr.bf16.mxu0 %v1452_v9  ;;  %v1589_v32 = vsel %vm1580_vm5, 1.0, %v1455_v31 }
  0x1e   : > { %1273 = vmatmul.mubr.msk.bf16.vlgmr.msra.gmra.mrb[0].mxu0 %vm329_vm1, %v303_v18  ;;  %1285 = vmatmul.mubr.bf16.vlgmr.msra.gmra.mrb[0].mxu1 %v1454_v19 }
  0x1f   : > { %1289 = vmatpush3.bf16.msra.mxu1 %v1548_v10  ;;  %1292 = vmatprep.mubr.msk.bf16.mxu1 %vm1453_vm2, %v1452_v9 }
  0x20   : > { %1290 = vmatprep.subr.bf16.mxu1 %v1452_v9  ;;  %1297 = vmatpush3.bf16.msra.mxu0 %v1548_v10 }
  0x21   : > { %1298 = vmatprep.subr.bf16.mxu0 %v1452_v9  ;;  %1276 = vmatprep.mubr.msk.bf16.mxu0 %vm329_vm1, %v304_v6 }
  0x23   : > { %1291 = vmatpush3.bf16.msra.mxu1 %v1551_v12 }
  0x24   : > { %1299 = vmatpush3.bf16.msra.mxu0 %v1551_v12  ;;  %1304 = vmatprep.subr.bf16.mxu1 %v1452_v9 }
  0x25   : > { %1312 = vmatprep.subr.bf16.mxu0 %v1452_v9 }
  0x26   : > { %1277 = vmatmul.mubr.msk.bf16.gmra.mrb[4].mxu0 %vm329_vm1, %v305_v8 }
  0x27   : > { %1300 = vmatprep.mubr.msk.bf16.mxu0 %vm1453_vm2, %v1452_v9 }
  0xf1   : > { %v1578_v23 = vpop.f32.mrb[0].mxu0  ;;  %v475_v24 = vpop.f32.mrb[0].mxu1 }
  0xf2   : > { %v376_v26 = vpop.f32.mrb[1].mxu0  ;;  %v1286_v27 = vpop.f32.mrb[1].mxu1  ;;  %v385_v21 = vadd.f32 %v1578_v23, %v1576_v22 }
  0xf3   : > { %v377_v28 = vadd.f32 %v1576_v22, %v376_v26  ;;  %v1585_v29 = vpop.f32.mrb[2].mxu0  ;;  %v478_v30 = vpop.f32.mrb[2].mxu1 }
  0xf4   : > { %v379_v33 = vpop.f32.mrb[3].mxu0  ;;  %v1287_v34 = vpop.f32.mrb[3].mxu1 }
  0xf5   : > { %v481_v35 = vadd.f32 %v475_v24, %v377_v28  ;;  %v380_v51 = vadd.f32 %v1576_v22, %v379_v33 }
  0xf7   : > { %v482_v36 = vmul.f32 %v481_v35, %v1589_v32 }
  0xf9   : > { %1380 = vtanh.f32 %v482_v36  ;;  %v1625_v16 = vpop.f32.mrb[4].mxu0 }
  0xfa   : > { %v1627_v17 = vpop.f32.mrb[5].mxu0 }
  0xfb   : > { %v1629_v18 = vpop.f32.mrb[6].mxu0  ;;  %v393_v3 = vadd.f32 %v1576_v22, %v1627_v17 }
  0xfc   : > { %v1631_v19 = vpop.f32.mrb[7].mxu0 }
 0x103   : > { %v1381_v37 = vpop.eup %1380 }
 0x104   : > { %v484_v38 = vmul.f32 0.5, %v1381_v37 }
 0x106   : > { %v485_v39 = vadd.f32 0.5, %v484_v38 }
 0x108   : > { %v486_v40 = vsel %vm1580_vm5, %v1381_v37, %v485_v39 }
 0x109   : > { %491 = vrot.lane.b32.xlu0 %v486_v40, %s1456_s23  ;;  %v489_v43 = vmul.f32 0.0, %v486_v40 }
 0x17b   : > { %v492_v41 = vpop.permute.xlu0 %491 }
 0x17c   : > { %v494_v42 = vmul.f32 %v492_v41, %v486_v40 }
 0x17e   : > { %496 = vrot.lane.b32.xlu0 %v494_v42, %s1457_s27 }
 0x1f0   : > { %v497_v44 = vpop.permute.xlu0 %496 }
 0x1f1   : > { %v499_v45 = vadd.f32 %v497_v44, %v489_v43 }
 0x1f3   : > { %1382 = vtanh.f32 %v499_v45 }
 0x1fd   : > { %v1383_v46 = vpop.eup %1382 }
 0x1fe   : > { %502 = vrot.lane.b32.xlu1 %v1383_v46, %s1456_s23  ;;  %v388_v46 = vadd.f32 %v1585_v29, %v1576_v22 }
 0x270   : > { %v503_v47 = vpop.permute.xlu1 %502 }
 0x271   : > { %v1597_v48 = vmul.f32 %v503_v47, %v486_v40 }
 0x273   : > { %v512_v49 = vpack.c.bf16 %v1597_v48, %v1597_v48 }
 0x275   : > { %514 = vrot.lane.b32.xlu1 %v512_v49, %s1457_s27 }
 0x2e7   : > { %v515_v50 = vpop.permute.xlu1 %514 }
 0x2e8   : > { %1293 = vmatmul.mubr.msk.bf16.vlgmr.msra.gmra.mrb[4].mxu1 %vm329_vm1, %v515_v50 }
 0x2e9   : > { %1305 = vmatpush3.bf16.msra.mxu1 %v1548_v10  ;;  %1308 = vmatprep.mubr.msk.bf16.mxu1 %vm1453_vm2, %v1452_v9 }
 0x2ea   : > { %1306 = vmatprep.subr.bf16.mxu1 %v1452_v9 }
 0x2ed   : > { %1307 = vmatpush3.bf16.msra.mxu1 %v1551_v12 }
 0x2ee   : > { %1320 = vmatprep.subr.bf16.mxu1 %v1452_v9 }
 0x3bb   : > { %v553_v52 = vpop.f32.mrb[4].mxu1 }
 0x3bc   : > { %v559_v53 = vadd.f32 %v553_v52, %v380_v51  ;;  %v1294_v54 = vpop.f32.mrb[5].mxu1 }
 0x3bd   : > { %v556_v55 = vpop.f32.mrb[6].mxu1 }
 0x3be   : > { %v560_v56 = vmul.f32 %v559_v53, %v1589_v32  ;;  %v1295_v57 = vpop.f32.mrb[7].mxu1 }
 0x3c0   : > { %1384 = vtanh.f32 %v560_v56 }
 0x3ca   : > { %v1385_v58 = vpop.eup %1384 }
 0x3cb   : > { %v562_v59 = vmul.f32 0.5, %v1385_v58 }
 0x3cd   : > { %v563_v60 = vadd.f32 0.5, %v562_v59 }
 0x3cf   : > { %v564_v61 = vsel %vm1580_vm5, %v1385_v58, %v563_v60 }
 0x3d0   : > { %569 = vrot.lane.b32.xlu0 %v564_v61, %s1456_s23  ;;  %v567_v0 = vmul.f32 %v564_v61, %v499_v45 }
 0x442   : > { %v570_v62 = vpop.permute.xlu0 %569 }
 0x443   : > { %v572_v63 = vmul.f32 %v570_v62, %v564_v61 }
 0x445   : > { %574 = vrot.lane.b32.xlu1 %v572_v63, %s1457_s27 }
 0x4b7   : > { %v575_v1 = vpop.permute.xlu1 %574 }
 0x4b8   : > { %v577_v2 = vadd.f32 %v575_v1, %v567_v0 }
 0x4ba   : > { %1386 = vtanh.f32 %v577_v2 }
 0x4c4   : > { %v1387_v11 = vpop.eup %1386 }
 0x4c5   : > { %580 = vrot.lane.b32.xlu0 %v1387_v11, %s1456_s23 }
 0x537   : > { %v581_v13 = vpop.permute.xlu0 %580 }
 0x538   : > { %v1620_v14 = vmul.f32 %v581_v13, %v564_v61 }
 0x53a   : > { %v590_v15 = vpack.c.bf16 %v1620_v14, %v1620_v14 }
 0x53c   : > { %592 = vrot.lane.b32.xlu1 %v590_v15, %s1457_s27 }
 0x5ae   : > { %v593_v20 = vpop.permute.xlu1 %592 }
 0x5af   : > { %1301 = vmatmul.mubr.msk.bf16.vlgmr.msra.gmra.mrb[8].mxu0 %vm329_vm1, %v593_v20 }
 0x5b0   : > { %1313 = vmatpush3.bf16.msra.mxu0 %v1548_v10  ;;  %1316 = vmatprep.mubr.msk.bf16.mxu0 %vm1453_vm2, %v1452_v9 }
 0x5b1   : > { %1314 = vmatprep.subr.bf16.mxu0 %v1452_v9 }
 0x5b4   : > { %1315 = vmatpush3.bf16.msra.mxu0 %v1551_v12 }
 0x5b5   : > { %1328 = vmatprep.subr.bf16.mxu0 %v1452_v9 }
 0x682   : > { %v631_v24 = vpop.f32.mrb[8].mxu0 }
 0x683   : > { %v637_v26 = vadd.f32 %v631_v24, %v385_v21  ;;  %v1302_v27 = vpop.f32.mrb[9].mxu0 }
 0x684   : > { %v634_v28 = vpop.f32.mrb[10].mxu0 }
 0x685   : > { %v638_v30 = vmul.f32 %v637_v26, %v1589_v32  ;;  %v1303_v31 = vpop.f32.mrb[11].mxu0 }
 0x687   : > { %1388 = vtanh.f32 %v638_v30 }
 0x691   : > { %v1389_v33 = vpop.eup %1388 }
 0x692   : > { %v640_v34 = vmul.f32 0.5, %v1389_v33 }
 0x694   : > { %v641_v35 = vadd.f32 0.5, %v640_v34 }
 0x696   : > { %v642_v36 = vsel %vm1580_vm5, %v1389_v33, %v641_v35 }
 0x697   : > { %647 = vrot.lane.b32.xlu0 %v642_v36, %s1456_s23  ;;  %v645_v23 = vmul.f32 %v642_v36, %v577_v2 }
 0x709   : > { %v648_v37 = vpop.permute.xlu0 %647 }
 0x70a   : > { %v650_v38 = vmul.f32 %v648_v37, %v642_v36 }
 0x70c   : > { %652 = vrot.lane.b32.xlu1 %v650_v38, %s1457_s27 }
 0x77e   : > { %v653_v39 = vpop.permute.xlu1 %652 }
 0x77f   : > { %v655_v40 = vadd.f32 %v653_v39, %v645_v23 }
 0x781   : > { %1390 = vtanh.f32 %v655_v40 }
 0x78b   : > { %v1391_v41 = vpop.eup %1390 }
 0x78c   : > { %658 = vrot.lane.b32.xlu0 %v1391_v41, %s1456_s23 }
 0x7fe   : > { %v659_v42 = vpop.permute.xlu0 %658 }
 0x7ff   : > { %v1648_v43 = vmul.f32 %v659_v42, %v642_v36  ;;  %v396_v36 = vadd.f32 %v1576_v22, %v1631_v19 }
 0x801   : > { %v668_v44 = vpack.c.bf16 %v1648_v43, %v1648_v43 }
 0x803   : > { %670 = vrot.lane.b32.xlu1 %v668_v44, %s1457_s27 }
 0x875   : > { %v671_v45 = vpop.permute.xlu1 %670 }
 0x876   : > { %1309 = vmatmul.mubr.msk.bf16.vlgmr.msra.gmra.mrb[8].mxu1 %vm329_vm1, %v671_v45 }
 0x877   : > { %1321 = vmatpush3.bf16.msra.mxu1 %v1548_v10  ;;  %1324 = vmatprep.mubr.msk.bf16.mxu1 %vm1453_vm2, %v1452_v9 }
 0x878   : > { %1322 = vmatprep.subr.bf16.mxu1 %v1452_v9 }
 0x87b   : > { %1323 = vmatpush3.bf16.msra.mxu1 %v1551_v12 }
 0x87c   : > { %1336 = vmatprep.subr.bf16.mxu1 %v1452_v9 }
 0x949   : > { %v709_v47 = vpop.f32.mrb[8].mxu1 }
 0x94a   : > { %v715_v49 = vadd.f32 %v709_v47, %v388_v46  ;;  %v1310_v50 = vpop.f32.mrb[9].mxu1 }
 0x94b   : > { %v712_v51 = vpop.f32.mrb[10].mxu1 }
 0x94c   : > { %v716_v52 = vmul.f32 %v715_v49, %v1589_v32  ;;  %v1311_v53 = vpop.f32.mrb[11].mxu1 }
 0x94e   : > { %1392 = vtanh.f32 %v716_v52 }
 0x958   : > { %v1393_v54 = vpop.eup %1392 }
 0x959   : > { %v718_v55 = vmul.f32 0.5, %v1393_v54 }
 0x95b   : > { %v719_v56 = vadd.f32 0.5, %v718_v55 }
 0x95d   : > { %v720_v57 = vsel %vm1580_vm5, %v1393_v54, %v719_v56  ;;  %v401_v54 = vadd.f32 %v1625_v16, %v1576_v22 }
 0x95e   : > { %725 = vrot.lane.b32.xlu0 %v720_v57, %s1456_s23  ;;  %v723_v29 = vmul.f32 %v720_v57, %v655_v40 }
 0x9d0   : > { %v726_v58 = vpop.permute.xlu0 %725 }
 0x9d1   : > { %v728_v59 = vmul.f32 %v726_v58, %v720_v57 }
 0x9d3   : > { %730 = vrot.lane.b32.xlu1 %v728_v59, %s1457_s27 }
 0xa45   : > { %v731_v60 = vpop.permute.xlu1 %730 }
 0xa46   : > { %v733_v61 = vadd.f32 %v731_v60, %v723_v29 }
 0xa48   : > { %1394 = vtanh.f32 %v733_v61 }
 0xa52   : > { %v1395_v62 = vpop.eup %1394 }
 0xa53   : > { %736 = vrot.lane.b32.xlu0 %v1395_v62, %s1456_s23 }
 0xac5   : > { %v737_v63 = vpop.permute.xlu0 %736 }
 0xac6   : > { %v1668_v0 = vmul.f32 %v737_v63, %v720_v57 }
 0xac8   : > { %v746_v1 = vpack.c.bf16 %v1668_v0, %v1668_v0 }
 0xaca   : > { %748 = vrot.lane.b32.xlu1 %v746_v1, %s1457_s27 }
 0xb3c   : > { %v749_v2 = vpop.permute.xlu1 %748 }
 0xb3d   : > { %1317 = vmatmul.mubr.msk.bf16.vlgmr.msra.gmra.mrb[12].mxu0 %vm329_vm1, %v749_v2 }
 0xb3e   : > { %1329 = vmatpush3.bf16.msra.mxu0 %v1548_v10  ;;  %1332 = vmatprep.mubr.msk.bf16.mxu0 %vm1453_vm2, %v1452_v9 }
 0xb3f   : > { %1330 = vmatprep.subr.bf16.mxu0 %v1452_v9 }
 0xb42   : > { %1331 = vmatpush3.bf16.msra.mxu0 %v1551_v12 }
 0xc10   : > { %v787_v4 = vpop.f32.mrb[12].mxu0 }
 0xc11   : > { %v793_v5 = vadd.f32 %v787_v4, %v393_v3  ;;  %v1318_v6 = vpop.f32.mrb[13].mxu0 }
 0xc12   : > { %v790_v7 = vpop.f32.mrb[14].mxu0 }
 0xc13   : > { %v794_v8 = vmul.f32 %v793_v5, %v1589_v32  ;;  %v1319_v11 = vpop.f32.mrb[15].mxu0 }
 0xc15   : > { %1396 = vtanh.f32 %v794_v8 }
 0xc1f   : > { %v1397_v13 = vpop.eup %1396 }
 0xc20   : > { %v796_v15 = vmul.f32 0.5, %v1397_v13 }
 0xc22   : > { %v797_v20 = vadd.f32 0.5, %v796_v15 }
 0xc24   : > { %v798_v21 = vsel %vm1580_vm5, %v1397_v13, %v797_v20  ;;  %v404_v13 = vadd.f32 %v1629_v18, %v1576_v22 }
 0xc25   : > { %803 = vrot.lane.b32.xlu0 %v798_v21, %s1456_s23  ;;  %v801_v17 = vmul.f32 %v798_v21, %v733_v61 }
 0xc97   : > { %v804_v24 = vpop.permute.xlu0 %803 }
 0xc98   : > { %v806_v26 = vmul.f32 %v804_v24, %v798_v21 }
 0xc9a   : > { %808 = vrot.lane.b32.xlu1 %v806_v26, %s1457_s27 }
 0xd0c   : > { %v809_v27 = vpop.permute.xlu1 %808 }
 0xd0d   : > { %v811_v28 = vadd.f32 %v809_v27, %v801_v17 }
 0xd0f   : > { %1398 = vtanh.f32 %v811_v28 }
 0xd19   : > { %v1399_v30 = vpop.eup %1398 }
 0xd1a   : > { %814 = vrot.lane.b32.xlu0 %v1399_v30, %s1456_s23 }
 0xd8c   : > { %v815_v31 = vpop.permute.xlu0 %814 }
 0xd8d   : > { %v1687_v33 = vmul.f32 %v815_v31, %v798_v21 }
 0xd8f   : > { %v824_v34 = vpack.c.bf16 %v1687_v33, %v1687_v33 }
 0xd91   : > { %826 = vrot.lane.b32.xlu1 %v824_v34, %s1457_s27 }
 0xe03   : > { %v827_v35 = vpop.permute.xlu1 %826 }
 0xe04   : > { %1325 = vmatmul.mubr.msk.bf16.vlgmr.msra.gmra.mrb[12].mxu1 %vm329_vm1, %v827_v35 }
 0xe05   : > { %1337 = vmatpush3.bf16.msra.mxu1 %v1548_v10  ;;  %1340 = vmatprep.mubr.msk.bf16.mxu1 %vm1453_vm2, %v1452_v9 }
 0xe06   : > { %1338 = vmatprep.subr.bf16.mxu1 %v1452_v9 }
 0xe09   : > { %1339 = vmatpush3.bf16.msra.mxu1 %v1551_v12 }
 0xed7   : > { %v865_v37 = vpop.f32.mrb[12].mxu1 }
 0xed8   : > { %v871_v38 = vadd.f32 %v865_v37, %v396_v36  ;;  %v1326_v23 = vpop.f32.mrb[13].mxu1 }
 0xed9   : > { %v868_v39 = vpop.f32.mrb[14].mxu1 }
 0xeda   : > { %v872_v40 = vmul.f32 %v871_v38, %v1589_v32  ;;  %v1327_v41 = vpop.f32.mrb[15].mxu1 }
 0xedb   : > { %v1458_v41 = vmov (!%p1224_p5), 0.0  }
 0xedc   : > { %1400 = vtanh.f32 %v872_v40  ;;  %1344 = vmatprep.subr.bf16.mxu0 (!%p1224_p5), %v1458_v41 }
 0xee6   : > { %v1401_v42 = vpop.eup %1400 }
 0xee7   : > { %v874_v10 = vmul.f32 0.5, %v1401_v42 }
 0xee9   : > { %v875_v44 = vadd.f32 0.5, %v874_v10  ;;  %v1413_v10 = vld [vmem:[%s1793_s4 + $0x8] sm:$0xff] (!%p1224_p5)  }
 0xeeb   : > { %v876_v45 = vsel %vm1580_vm5, %v1401_v42, %v875_v44  ;;  %v1412_v42 = vld [vmem:[%s1793_s4] sm:$0xff] (!%p1224_p5)  }
 0xeec   : > { %881 = vrot.lane.b32.xlu0 %v876_v45, %s1456_s23  ;;  %v879_v19 = vmul.f32 %v876_v45, %v811_v28 }
 0xf5e   : > { %v882_v9 = vpop.permute.xlu0 %881 }
 0xf5f   : > { %v884_v12 = vmul.f32 %v882_v9, %v876_v45 }
 0xf61   : > { %886 = vrot.lane.b32.xlu1 %v884_v12, %s1457_s27 }
 0xfd3   : > { %v887_v46 = vpop.permute.xlu1 %886 }
 0xfd4   : > { %v889_v47 = vadd.f32 %v887_v46, %v879_v19 }
 0xfd6   : > { %1402 = vtanh.f32 %v889_v47 }
 0xfe0   : > { %v1403_v49 = vpop.eup %1402 }
 0xfe1   : > { %892 = vrot.lane.b32.xlu0 %v1403_v49, %s1456_s23 }
0x1053   : > { %v893_v50 = vpop.permute.xlu0 %892 }
0x1054   : > { %v1706_v51 = vmul.f32 %v893_v50, %v876_v45  ;;  %v1225_v45 = vld [vmem:[%s1794_s5] ss:$0 sm:$0xff] (!%p1224_p5) }
0x1056   : > { %v902_v52 = vpack.c.bf16 %v1706_v51, %v1706_v51 }
0x1058   : > { %904 = vrot.lane.b32.xlu1 %v902_v52, %s1457_s27 }
0x10ca   : > { %v905_v53 = vpop.permute.xlu1 %904 }
0x10cb   : > { %1333 = vmatmul.mubr.msk.bf16.vlgmr.msra.gmra.mrb[16].mxu0 %vm329_vm1, %v905_v53 }
0x10cc   : > { %1348 = vmatprep.mubr.msk.bf16.mxu0 (!%p1224_p5), %vm1460_vm6, %v1458_v41  ;;  %1345 = vmatpush3.bf16.msra.mxu0 (!%p1224_p5), %v1412_v42 }
0x10cd   : > { %1346 = vmatprep.subr.bf16.mxu0 (!%p1224_p5), %v1458_v41 }
0x10d0   : > { %1347 = vmatpush3.bf16.msra.mxu0 (!%p1224_p5), %v1413_v10 }
0x119e   : > { %v943_v55 = vpop.f32.mrb[16].mxu0 }
0x119f   : > { %v949_v56 = vadd.f32 %v943_v55, %v401_v54  ;;  %v1334_v57 = vpop.f32.mrb[17].mxu0 }
0x11a0   : > { %v946_v58 = vpop.f32.mrb[18].mxu0 }
0x11a1   : > { %v950_v59 = vmul.f32 %v949_v56, %v1589_v32  ;;  %v1335_v29 = vpop.f32.mrb[19].mxu0 }
0x11a3   : > { %1404 = vtanh.f32 %v950_v59 }
0x11ad   : > { %v1405_v60 = vpop.eup %1404 }
0x11ae   : > { %v952_v61 = vmul.f32 0.5, %v1405_v60 }
0x11b0   : > { %v953_v62 = vadd.f32 0.5, %v952_v61 }
0x11b2   : > { %v954_v63 = vsel %vm1580_vm5, %v1405_v60, %v953_v62 }
0x11b3   : > { %959 = vrot.lane.b32.xlu0 %v954_v63, %s1456_s23  ;;  %v957_v16 = vmul.f32 %v954_v63, %v889_v47 }
0x1225   : > { %v960_v1 = vpop.permute.xlu0 %959 }
0x1226   : > { %v962_v2 = vmul.f32 %v960_v1, %v954_v63 }
0x1228   : > { %964 = vrot.lane.b32.xlu1 %v962_v2, %s1457_s27 }
0x129a   : > { %v965_v3 = vpop.permute.xlu1 %964 }
0x129b   : > { %v967_v4 = vadd.f32 %v965_v3, %v957_v16 }
0x129d   : > { %1406 = vtanh.f32 %v967_v4 }
0x12a7   : > { %v1407_v5 = vpop.eup %1406 }
0x12a8   : > { %970 = vrot.lane.b32.xlu0 %v1407_v5, %s1456_s23 }
0x131a   : > { %v971_v6 = vpop.permute.xlu0 %970 }
0x131b   : > { %v973_v7 = vmul.f32 %v971_v6, %v954_v63 }
0x131d   : > { %v980_v8 = vpack.c.bf16 %v973_v7, %v973_v7 }
0x131f   : > { %982 = vrot.lane.b32.xlu1 %v980_v8, %s1457_s27 }
0x1391   : > { %v983_v11 = vpop.permute.xlu1 %982 }
0x1392   : > { %1341 = vmatmul.mubr.msk.bf16.vlgmr.msra.gmra.mrb[16].mxu1 %vm329_vm1, %v983_v11 }
0x1465   : > { %v1021_v15 = vpop.f32.mrb[16].mxu1 }
0x1466   : > { %v1027_v20 = vadd.f32 %v1021_v15, %v404_v13  ;;  %v1342_v21 = vpop.f32.mrb[17].mxu1 }
0x1467   : > { %v1024_v24 = vpop.f32.mrb[18].mxu1 }
0x1468   : > { %v1028_v26 = vmul.f32 %v1027_v20, %v1589_v32  ;;  %v1343_v17 = vpop.f32.mrb[19].mxu1 }
0x146a   : > { %1408 = vtanh.f32 %v1028_v26 }
0x1474   : > { %v1409_v27 = vpop.eup %1408 }
0x1475   : > { %v1030_v28 = vmul.f32 0.5, %v1409_v27 }
0x1477   : > { %v1031_v30 = vadd.f32 0.5, %v1030_v28 }
0x1479   : > { %v1032_v31 = vsel %vm1580_vm5, %v1409_v27, %v1031_v30 }
0x147a   : > { %1037 = vrot.lane.b32.xlu0 %v1032_v31, %s1456_s23  ;;  %v1035_v22 = vmul.f32 %v1032_v31, %v967_v4 }
0x14ec   : > { %v1038_v34 = vpop.permute.xlu0 %1037 }
0x14ed   : > { %v1040_v35 = vmul.f32 %v1038_v34, %v1032_v31 }
0x14ef   : > { %1042 = vrot.lane.b32.xlu1 %v1040_v35, %s1457_s27 }
0x14f3   : > { %507 = vrot.lane.b32.xlu1 %v1597_v48, %s1457_s27 }
0x14f7   : > { %663 = vrot.lane.b32.xlu1 %v1648_v43, %s1457_s27 }
0x14fb   : > { %819 = vrot.lane.b32.xlu1 %v1687_v33, %s1457_s27 }
0x14ff   : > { %975 = vrot.lane.b32.xlu1 %v973_v7, %s1457_s27 }
0x1561   : > { %v1043_v25 = vpop.permute.xlu1 %1042 }
0x1562   : > { %v1045_v32 = vadd.f32 %v1043_v25, %v1035_v22 }
0x1564   : > { %1410 = vtanh.f32 %v1045_v32 }
0x1565   : > { %v508_v18 = vpop.permute.xlu1 %507 }
0x1566   : > { %510 = vst.msk [vmem:[#allocation2] sm:$0xff] %vm329_vm1, %v508_v18 }
0x1569   : > { %v664_v36 = vpop.permute.xlu1 %663 }
0x156a   : > { %666 = vst.msk [vmem:[#allocation2 + $0x10] sm:$0xff] %vm329_vm1, %v664_v36 }
0x156d   : > { %v820_v37 = vpop.permute.xlu1 %819 }
0x156e   : > { %v1411_v48 = vpop.eup %1410  ;;  %822 = vst.msk [vmem:[#allocation2 + $0x20] sm:$0xff] %vm329_vm1, %v820_v37 }
0x156f   : > { %1048 = vrot.lane.b32.xlu0 %v1411_v48, %s1456_s23 }
0x1571   : > { %v976_v43 = vpop.permute.xlu1 %975 }
0x1572   : > { %978 = vst.msk [vmem:[#allocation2 + $0x30] sm:$0xff] %vm329_vm1, %v976_v43 }
0x1573   : > { %585 = vrot.lane.b32.xlu0 %v1620_v14, %s1457_s27 }
0x1577   : > { %741 = vrot.lane.b32.xlu0 %v1668_v0, %s1457_s27 }
0x157b   : > { %897 = vrot.lane.b32.xlu0 %v1706_v51, %s1457_s27 }
0x15e1   : > { %v1049_v33 = vpop.permute.xlu0 %1048 }
0x15e2   : > { %v1051_v38 = vmul.f32 %v1049_v33, %v1032_v31 }
0x15e4   : > { %1053 = vrot.lane.b32.xlu0 %v1051_v38, %s1457_s27  ;;  %v1061_v0 = vpack.c.bf16 (!%p1224_p5), %v1051_v38, %v1051_v38 }
0x15e5   : > { %v586_v23 = vpop.permute.xlu0 %585 }
0x15e6   : > { %588 = vst.msk [vmem:[#allocation2 + $0x8] sm:$0xff] %vm329_vm1, %v586_v23 }
0x15e8   : > { %1074 = vrot.lane.b32.xlu0 (!%p1224_p5), %v1061_v0, %s1459_s10 }
0x15e9   : > { %v742_v39 = vpop.permute.xlu0 %741 }
0x15ea   : > { %744 = vst.msk [vmem:[#allocation2 + $0x18] sm:$0xff] %vm329_vm1, %v742_v39 }
0x15ed   : > { %v898_v40 = vpop.permute.xlu0 %897 }
0x15ee   : > { %900 = vst.msk [vmem:[#allocation2 + $0x28] sm:$0xff] %vm329_vm1, %v898_v40 }
0x1651   : > { %1060 = sbr.rel (%p1224_p5) target bundleno = 5938 (0x1732), region = 52 }
0x1656   : > { %v1054_v14 = vpop.permute.xlu0 %1053 }
0x1657   : > { %1056 = vst.msk [vmem:[#allocation2 + $0x38] sm:$0xff] %vm329_vm1, %v1054_v14 }
0x165a   : > { %v1075_v44 = vpop.permute.xlu0 %1074 }
0x165b   : > { %1349 = vmatmul.mubr.msk.bf16.vlgmr.msra.gmra.mrb[0].mxu0 %vm329_vm1, %v1075_v44 }
0x172e   : > { %v1125_v9 = vpop.f32.mrb[0].mxu0 }
0x172f   : > { %v1126_v12 = vadd.f32 %v1225_v45, %v1125_v9  ;;  %v1350_v19 = vpop.f32.mrb[1].mxu0 }
0x1730   : > { %v1128_v46 = vpop.f32.mrb[2].mxu0 }
0x1731   : > { %1131 = vst [vmem:[#allocation5] sm:$0xff] %v1126_v12  ;;  %v1351_v47 = vpop.f32.mrb[3].mxu0 }
0x1732 PF: > { %p1356_p6 = scmp.eq.s32.totalorder %s1503_s22, 1  ;;  %s1461_s15 = smov [#allocation5]  }
0x1733   : > { %s1139_s16 = sshll.u32 %s1461_s15, 4  ;;  %s1140_s16 = int_to_ptr.vmem [resolvable:$true] %s1139_s16 }
0x1734   : > { %s1414_s17 = scalar_lea.vmem %s1140_s16, 128  ;;  %p1421_p10 = scmp.lt.s32.totalorder %s1140_s16, %s1140_s16 }
0x1735   : > { %p1415_p7 = scmp.ne.s32.totalorder %s1140_s16, %s1414_s17  ;;  %p1422_p11 = scmp.lt.s32.totalorder %s1414_s17, %s1414_s17 }
0x1737   : > { %p1416_p8 = pnand %p1415_p7, %p1356_p6  ;;  %p1423_p12 = por %p1422_p11, %p1421_p10 }
0x1739   : > { %p1417_p9 = pneg %p1416_p8 }
0x173b   : > { %p1424_p13 = pnand %p1423_p12, %p1417_p9 }
0x173d   : > { %1427 = shalt.err (!%p1424_p13)
}
0x173e   : > { %s1428_s20 = scalar_lea.hbm %s1795_s6, 128 }
0x173f   : > { %p1429_p0 = scmp.ne.s32.totalorder %s1795_s6, %s1428_s20  ;;  %p1434_p3 = scmp.lt.u32.totalorder %s1428_s20, %s1795_s6 }
0x1741   : > { %p1430_p1 = pnand %p1429_p0, %p1356_p6 }
0x1743   : > { %p1431_p2 = pneg %p1430_p1 }
0x1745   : > { %p1436_p4 = pnand %p1434_p3, %p1431_p2 }
0x1747   : > { %1439 = shalt.err (!%p1436_p4)
}
0x1748   : > { %1353 = dma.vmem_to_hbm [thread:$0]  (%p1356_p6), %s1140_s16, 128, %s1795_s6, [#allocation6]  }
0x1749   : > { %1445 = dma.done.wait (%p1356_p6), [#allocation6], 128  }
0x174a   : > { %1447 = vsyncadd (%p1356_p6), [#allocation6], 4294967168 }
0x174b PF: > { %s17_s21 = sadd.s32 1, %s1450_s21  }
0x174c   : > { %p14_p5 = scmp.ge.s32.totalorder %s17_s21, 4  }
0x174e   :  { %16 = sbr.rel (!%p14_p5) target bundleno = 1 (0x1), region = 85 }
0x1755   :  { %1152 = vsyncpa [#allocation6], 1 }
0x1756   :  { %1154 = vsyncpa [#allocation6 + $0x1], 1 }

</bundles_post_ra>
